<compile_context>
chip_gen: v7x
topology: tpu7x:2x2x1
jax: 0.10.0
libtpu: 0.0.40
codegen_flags: <defaults>
</compile_context>

<pallas_src>
import functools
import math

import jax
import jax.numpy as jnp
from jax.experimental import pallas as pl
from jax.experimental.pallas import tpu as pltpu

LOG_SIG_MAX = 2.0
LOG_SIG_MIN = -20.0

# The original file references global NAS choice lists; use small plausible stand-ins.
CONV_TYPE = ("conv3x3", "conv5x5", "sep3x3")
NORM_TYPE = ("batch", "instance", "none")
UP_TYPE = ("nearest", "bilinear", "deconv")
SHORT_CUT_TYPE = ("add", "concat")
SKIP_TYPE = ("skip", "none")

HEAD_DIMS = (
    len(CONV_TYPE),       # mean/log_std head 1
    len(NORM_TYPE),       # head 2
    len(UP_TYPE),         # head 3
    len(SHORT_CUT_TYPE),  # head 4
    len(SKIP_TYPE),       # head 5
    len(SKIP_TYPE),       # head 6
)


def _round_up(x, m):
    return (x + m - 1) // m * m


# ---------------------------------------------------------------------------
# Kernel
# ---------------------------------------------------------------------------
def _policy_kernel(x_ref, w1_ref, b1_ref, w2_ref, b2_ref,
                   wm_ref, bm_ref, ws_ref, bs_ref,
                   mean_ref, logstd_ref, *, compute_dtype):
    # hidden layer 1: relu(x @ W1 + b1)   (MXU dot, f32 accumulate, f32 elementwise)
    x = x_ref[...].astype(compute_dtype)
    h1 = jnp.dot(x, w1_ref[...], preferred_element_type=jnp.float32) + b1_ref[...]
    h1 = jnp.maximum(h1, 0.0).astype(compute_dtype)

    # hidden layer 2: relu(h1 @ W2 + b2)
    h2 = jnp.dot(h1, w2_ref[...], preferred_element_type=jnp.float32) + b2_ref[...]
    h2 = jnp.maximum(h2, 0.0).astype(compute_dtype)

    # all 6 mean heads fused into one lane-dense matmul
    mean_ref[...] = (
        jnp.dot(h2, wm_ref[...], preferred_element_type=jnp.float32) + bm_ref[...]
    )

    # all 6 log_std heads fused, with the clamp applied in-kernel (VPU min/max)
    ls = jnp.dot(h2, ws_ref[...], preferred_element_type=jnp.float32) + bs_ref[...]
    logstd_ref[...] = jnp.clip(ls, LOG_SIG_MIN, LOG_SIG_MAX)


# ---------------------------------------------------------------------------
# Parameter init (Xavier-uniform weights, like weights_init_; biases random here
# purely so the correctness check also exercises the bias-add path — PyTorch
# init would set them to 0).
# ---------------------------------------------------------------------------
def init_gaussian_policy_params(key, num_inputs, hidden_dim, head_dims):
    n_heads = len(head_dims)
    ks = jax.random.split(key, 2 * (2 + 2 * n_heads))

    def xavier(k, fan_in, fan_out):
        bound = math.sqrt(6.0 / (fan_in + fan_out))
        return jax.random.uniform(k, (fan_in, fan_out), jnp.float32, -bound, bound)

    def small(k, n):
        return 0.1 * jax.random.normal(k, (n,), jnp.float32)

    ki = iter(ks)
    params = {
        "w1": xavier(next(ki), num_inputs, hidden_dim),
        "b1": small(next(ki), hidden_dim),
        "w2": xavier(next(ki), hidden_dim, hidden_dim),
        "b2": small(next(ki), hidden_dim),
        "mean_w": [xavier(next(ki), hidden_dim, d) for d in head_dims],
        "mean_b": [small(next(ki), d) for d in head_dims],
        "log_std_w": [xavier(next(ki), hidden_dim, d) for d in head_dims],
        "log_std_b": [small(next(ki), d) for d in head_dims],
    }
    return params


# ---------------------------------------------------------------------------
# One-time packing: pad K / hidden / N to multiples of 128, concatenate the 6
# mean heads and the 6 log_std heads each into one matrix, optionally cast
# weights to bf16 (biases stay f32 since they are added to f32 accumulators).
# ---------------------------------------------------------------------------
def pack_gaussian_policy_params(params, num_inputs, hidden_dim, head_dims,
                                compute_dtype=jnp.float32):
    k_pad = _round_up(num_inputs, 128)
    h_pad = _round_up(hidden_dim, 128)
    n_out = sum(head_dims)
    n_pad = _round_up(n_out, 128)

    w1 = jnp.zeros((k_pad, h_pad), jnp.float32).at[:num_inputs, :hidden_dim].set(params["w1"])
    b1 = jnp.zeros((1, h_pad), jnp.float32).at[0, :hidden_dim].set(params["b1"])
    w2 = jnp.zeros((h_pad, h_pad), jnp.float32).at[:hidden_dim, :hidden_dim].set(params["w2"])
    b2 = jnp.zeros((1, h_pad), jnp.float32).at[0, :hidden_dim].set(params["b2"])

    wm = jnp.zeros((h_pad, n_pad), jnp.float32)
    bm = jnp.zeros((1, n_pad), jnp.float32)
    ws = jnp.zeros((h_pad, n_pad), jnp.float32)
    bs = jnp.zeros((1, n_pad), jnp.float32)
    off = 0
    for i, d in enumerate(head_dims):
        wm = wm.at[:hidden_dim, off:off + d].set(params["mean_w"][i])
        bm = bm.at[0, off:off + d].set(params["mean_b"][i])
        ws = ws.at[:hidden_dim, off:off + d].set(params["log_std_w"][i])
        bs = bs.at[0, off:off + d].set(params["log_std_b"][i])
        off += d

    wd = compute_dtype
    return {
        "w1": w1.astype(wd), "b1": b1,
        "w2": w2.astype(wd), "b2": b2,
        "wm": wm.astype(wd), "bm": bm,
        "ws": ws.astype(wd), "bs": bs,
        "compute_dtype": wd,
        "num_inputs": num_inputs,
        "head_dims": tuple(head_dims),
    }


# ---------------------------------------------------------------------------
# Forward wrapper
# ---------------------------------------------------------------------------
def gaussian_policy_forward(state, packed, *, tile_b=512):
    """Returns the 12-tuple (mean_1, log_std_1, ..., mean_6, log_std_6)."""
    head_dims = packed["head_dims"]
    num_inputs = packed["num_inputs"]
    compute_dtype = packed["compute_dtype"]

    B = state.shape[0]
    k_pad = packed["w1"].shape[0]
    h_pad = packed["w1"].shape[1]
    n_pad = packed["wm"].shape[1]

    # Large batch tile (amortizes ~0.35us/step overhead); small batches round to a sublane.
    tile_b = min(tile_b, _round_up(B, 8))
    b_pad = _round_up(B, tile_b)
    grid = (b_pad // tile_b,)

    # Pad batch rows and K columns with zeros (lane/sublane aligned DMAs).
    x = jnp.zeros((b_pad, k_pad), compute_dtype)
    x = x.at[:B, :num_inputs].set(state.astype(compute_dtype))

    def resident(shape):
        # Weights/biases: same block every grid step -> stay pinned in VMEM.
        return pl.BlockSpec(shape, lambda i: (0, 0))

    itemsize = jnp.dtype(compute_dtype).itemsize
    flops = 2 * b_pad * (k_pad * h_pad + h_pad * h_pad + 2 * h_pad * n_pad)
    bytes_accessed = (
        b_pad * k_pad * itemsize                                  # input
        + (k_pad * h_pad + h_pad * h_pad + 2 * h_pad * n_pad) * itemsize  # weights
        + (2 * h_pad + 2 * n_pad) * 4                             # biases
        + 2 * b_pad * n_pad * 4                                   # outputs
    )

    kernel = functools.partial(_policy_kernel, compute_dtype=compute_dtype)

    mean_all, logstd_all = pl.pallas_call(
        kernel,
        out_shape=(
            jax.ShapeDtypeStruct((b_pad, n_pad), jnp.float32),
            jax.ShapeDtypeStruct((b_pad, n_pad), jnp.float32),
        ),
        grid=grid,
        in_specs=[
            pl.BlockSpec((tile_b, k_pad), lambda i: (i, 0)),   # state tile streams
            resident((k_pad, h_pad)), resident((1, h_pad)),    # W1, b1
            resident((h_pad, h_pad)), resident((1, h_pad)),    # W2, b2
            resident((h_pad, n_pad)), resident((1, n_pad)),    # packed mean heads
            resident((h_pad, n_pad)), resident((1, n_pad)),    # packed log_std heads
        ],
        out_specs=(
            pl.BlockSpec((tile_b, n_pad), lambda i: (i, 0)),
            pl.BlockSpec((tile_b, n_pad), lambda i: (i, 0)),
        ),
        compiler_params=pltpu.CompilerParams(
            dimension_semantics=("parallel",)),
        cost_estimate=pl.CostEstimate(
            flops=flops, transcendentals=0, bytes_accessed=bytes_accessed),
    )(
        x,
        packed["w1"], packed["b1"],
        packed["w2"], packed["b2"],
        packed["wm"], packed["bm"],
        packed["ws"], packed["bs"],
    )

    # Un-pad and split back into the 12 per-head outputs (mean_i, log_std_i interleaved).
    outputs = []
    off = 0
    for d in head_dims:
        outputs.append(mean_all[:B, off:off + d])
        outputs.append(logstd_all[:B, off:off + d])
        off += d
    return tuple(outputs)


# ---------------------------------------------------------------------------
# Pure-JAX reference for correctness checking
# ---------------------------------------------------------------------------
def gaussian_policy_reference(state, params, head_dims):
    h1 = jnp.maximum(state @ params["w1"] + params["b1"], 0.0)
    h2 = jnp.maximum(h1 @ params["w2"] + params["b2"], 0.0)
    outs = []
    for i, _ in enumerate(head_dims):
        mean = h2 @ params["mean_w"][i] + params["mean_b"][i]
        log_std = jnp.clip(h2 @ params["log_std_w"][i] + params["log_std_b"][i],
                           LOG_SIG_MIN, LOG_SIG_MAX)
        outs.append(mean)
        outs.append(log_std)
    return tuple(outs)


# TODO(synk): GaussianPolicy.sample() (rsample + tanh squash + log_prob correction) is a
# separate stochastic method, not part of forward(); it is intentionally not kernelized here.

if __name__ == "__main__":
    key = jax.random.PRNGKey(0)
    k_param, k_state = jax.random.split(key)

    batch = 2
    num_inputs = 32
    hidden_dim = 256

    params = init_gaussian_policy_params(k_param, num_inputs, hidden_dim, HEAD_DIMS)
    state = jax.random.normal(k_state, (batch, num_inputs), jnp.float32)

    ref = gaussian_policy_reference(state, params, HEAD_DIMS)
    expected_dims = [d for hd in HEAD_DIMS for d in (hd, hd)]

    # --- f32 path (tight correctness check) ---
    packed_f32 = pack_gaussian_policy_params(
        params, num_inputs, hidden_dim, HEAD_DIMS, jnp.float32)
    out = gaussian_policy_forward(state, packed_f32)
    out = jax.block_until_ready(out)

    assert len(out) == 12
    for o, r, d in zip(out, ref, expected_dims):
        assert o.shape == (batch, d), (o.shape, d)
        assert jnp.allclose(o, r, atol=1e-4, rtol=1e-4), "f32 mismatch vs reference"

    # --- bf16 weights/activations, f32 accumulate (fast path on v6e/v7x) ---
    packed_bf16 = pack_gaussian_policy_params(
        params, num_inputs, hidden_dim, HEAD_DIMS, jnp.bfloat16)
    out_bf16 = gaussian_policy_forward(state, packed_bf16)
    out_bf16 = jax.block_until_ready(out_bf16)
    for o, r in zip(out_bf16, ref):
        assert jnp.allclose(o, r, atol=5e-2, rtol=5e-2), "bf16 mismatch vs reference"

    print("KERNEL_OK")
</pallas_src>

<mosaic_0001>
module attributes {stable_mosaic.version = 11 : i64} {
  func.func @_policy_kernel(%arg0: i32, %arg1: memref<8x128xf32, #tpu.memory_space<vmem>>, %arg2: memref<128x256xf32, #tpu.memory_space<vmem>>, %arg3: memref<1x256xf32, #tpu.memory_space<vmem>>, %arg4: memref<256x256xf32, #tpu.memory_space<vmem>>, %arg5: memref<1x256xf32, #tpu.memory_space<vmem>>, %arg6: memref<256x128xf32, #tpu.memory_space<vmem>>, %arg7: memref<1x128xf32, #tpu.memory_space<vmem>>, %arg8: memref<256x128xf32, #tpu.memory_space<vmem>>, %arg9: memref<1x128xf32, #tpu.memory_space<vmem>>, %arg10: memref<8x128xf32, #tpu.memory_space<vmem>>, %arg11: memref<8x128xf32, #tpu.memory_space<vmem>>) attributes {dimension_semantics = [#tpu.dimension_semantics<parallel>], iteration_bounds = array<i64: 1>, scalar_prefetch = 0 : i64, scratch_operands = 0 : i64, tpu.core_type = #tpu.core_type<tc>, window_params = [{transform_indices = @transform_0, window_bounds = array<i64: 8, 128>}, {pipeline_mode = #tpu.pipeline_mode<synchronous>, transform_indices = @transform_1, window_bounds = array<i64: 128, 256>}, {pipeline_mode = #tpu.pipeline_mode<synchronous>, transform_indices = @transform_2, window_bounds = array<i64: 1, 256>}, {pipeline_mode = #tpu.pipeline_mode<synchronous>, transform_indices = @transform_3, window_bounds = array<i64: 256, 256>}, {pipeline_mode = #tpu.pipeline_mode<synchronous>, transform_indices = @transform_4, window_bounds = array<i64: 1, 256>}, {pipeline_mode = #tpu.pipeline_mode<synchronous>, transform_indices = @transform_5, window_bounds = array<i64: 256, 128>}, {pipeline_mode = #tpu.pipeline_mode<synchronous>, transform_indices = @transform_6, window_bounds = array<i64: 1, 128>}, {pipeline_mode = #tpu.pipeline_mode<synchronous>, transform_indices = @transform_7, window_bounds = array<i64: 256, 128>}, {pipeline_mode = #tpu.pipeline_mode<synchronous>, transform_indices = @transform_8, window_bounds = array<i64: 1, 128>}, {transform_indices = @transform_9, window_bounds = array<i64: 8, 128>}, {transform_indices = @transform_10, window_bounds = array<i64: 8, 128>}]} {
    %c0 = arith.constant 0 : index
    %c0_0 = arith.constant 0 : index
    %0 = vector.load %arg1[%c0, %c0_0] : memref<8x128xf32, #tpu.memory_space<vmem>>, vector<8x128xf32>
    %c0_1 = arith.constant 0 : index
    %c0_2 = arith.constant 0 : index
    %1 = vector.load %arg2[%c0_1, %c0_2] : memref<128x256xf32, #tpu.memory_space<vmem>>, vector<128x256xf32>
    %cst = arith.constant dense<0.000000e+00> : vector<8x256xf32>
    %2 = tpu.matmul %0, %1, %cst {dimension_numbers = #tpu.dot_dimension_numbers<[1], [0], [0], [1], [0, 0, 1, 1], [], []>} : vector<8x128xf32>, vector<128x256xf32>, vector<8x256xf32> -> vector<8x256xf32>
    %c0_3 = arith.constant 0 : index
    %c0_4 = arith.constant 0 : index
    %3 = vector.load %arg3[%c0_3, %c0_4] : memref<1x256xf32, #tpu.memory_space<vmem>>, vector<1x256xf32>
    %4 = vector.broadcast %3 : vector<1x256xf32> to vector<8x256xf32>
    %5 = arith.addf %2, %4 : vector<8x256xf32>
    %cst_5 = arith.constant 0.000000e+00 : f32
    %6 = vector.broadcast %cst_5 : f32 to vector<8x256xf32>
    %7 = arith.maximumf %5, %6 : vector<8x256xf32>
    %c0_6 = arith.constant 0 : index
    %c0_7 = arith.constant 0 : index
    %8 = vector.load %arg4[%c0_6, %c0_7] : memref<256x256xf32, #tpu.memory_space<vmem>>, vector<256x256xf32>
    %cst_8 = arith.constant dense<0.000000e+00> : vector<8x256xf32>
    %9 = tpu.matmul %7, %8, %cst_8 {dimension_numbers = #tpu.dot_dimension_numbers<[1], [0], [0], [1], [0, 0, 1, 1], [], []>} : vector<8x256xf32>, vector<256x256xf32>, vector<8x256xf32> -> vector<8x256xf32>
    %c0_9 = arith.constant 0 : index
    %c0_10 = arith.constant 0 : index
    %10 = vector.load %arg5[%c0_9, %c0_10] : memref<1x256xf32, #tpu.memory_space<vmem>>, vector<1x256xf32>
    %11 = vector.broadcast %10 : vector<1x256xf32> to vector<8x256xf32>
    %12 = arith.addf %9, %11 : vector<8x256xf32>
    %cst_11 = arith.constant 0.000000e+00 : f32
    %13 = vector.broadcast %cst_11 : f32 to vector<8x256xf32>
    %14 = arith.maximumf %12, %13 : vector<8x256xf32>
    %c0_12 = arith.constant 0 : index
    %c0_13 = arith.constant 0 : index
    %15 = vector.load %arg6[%c0_12, %c0_13] : memref<256x128xf32, #tpu.memory_space<vmem>>, vector<256x128xf32>
    %cst_14 = arith.constant dense<0.000000e+00> : vector<8x128xf32>
    %16 = tpu.matmul %14, %15, %cst_14 {dimension_numbers = #tpu.dot_dimension_numbers<[1], [0], [0], [1], [0, 0, 1, 1], [], []>} : vector<8x256xf32>, vector<256x128xf32>, vector<8x128xf32> -> vector<8x128xf32>
    %c0_15 = arith.constant 0 : index
    %c0_16 = arith.constant 0 : index
    %17 = vector.load %arg7[%c0_15, %c0_16] : memref<1x128xf32, #tpu.memory_space<vmem>>, vector<1x128xf32>
    %18 = vector.broadcast %17 : vector<1x128xf32> to vector<8x128xf32>
    %19 = arith.addf %16, %18 : vector<8x128xf32>
    %c0_17 = arith.constant 0 : index
    %c0_18 = arith.constant 0 : index
    %20 = vector.load %arg10[%c0_17, %c0_18] : memref<8x128xf32, #tpu.memory_space<vmem>>, vector<8x128xf32>
    tpu.vector_store %arg10[%c0_17, %c0_18], %19 {strides = array<i32>} : memref<8x128xf32, #tpu.memory_space<vmem>>, vector<8x128xf32>,
    %c0_19 = arith.constant 0 : index
    %c0_20 = arith.constant 0 : index
    %21 = vector.load %arg8[%c0_19, %c0_20] : memref<256x128xf32, #tpu.memory_space<vmem>>, vector<256x128xf32>
    %cst_21 = arith.constant dense<0.000000e+00> : vector<8x128xf32>
    %22 = tpu.matmul %14, %21, %cst_21 {dimension_numbers = #tpu.dot_dimension_numbers<[1], [0], [0], [1], [0, 0, 1, 1], [], []>} : vector<8x256xf32>, vector<256x128xf32>, vector<8x128xf32> -> vector<8x128xf32>
    %c0_22 = arith.constant 0 : index
    %c0_23 = arith.constant 0 : index
    %23 = vector.load %arg9[%c0_22, %c0_23] : memref<1x128xf32, #tpu.memory_space<vmem>>, vector<1x128xf32>
    %24 = vector.broadcast %23 : vector<1x128xf32> to vector<8x128xf32>
    %25 = arith.addf %22, %24 : vector<8x128xf32>
    %cst_24 = arith.constant -2.000000e+01 : f32
    %cst_25 = arith.constant 2.000000e+00 : f32
    %26 = vector.broadcast %cst_24 : f32 to vector<8x128xf32>
    %27 = arith.maximumf %26, %25 : vector<8x128xf32>
    %28 = vector.broadcast %cst_25 : f32 to vector<8x128xf32>
    %29 = arith.minimumf %28, %27 : vector<8x128xf32>
    %c0_26 = arith.constant 0 : index
    %c0_27 = arith.constant 0 : index
    %30 = vector.load %arg11[%c0_26, %c0_27] : memref<8x128xf32, #tpu.memory_space<vmem>>, vector<8x128xf32>
    tpu.vector_store %arg11[%c0_26, %c0_27], %29 {strides = array<i32>} : memref<8x128xf32, #tpu.memory_space<vmem>>, vector<8x128xf32>,
    return
  }
  func.func @transform_0(%arg0: i32) -> (i32, i32) {
    %c0_i32 = arith.constant 0 : i32
    %c0_i32_0 = arith.constant 0 : i32
    return %arg0, %c0_i32 : i32, i32
  }
  func.func @transform_1(%arg0: i32) -> (i32, i32) {
    %c0_i32 = arith.constant 0 : i32
    %c0_i32_0 = arith.constant 0 : i32
    %c0_i32_1 = arith.constant 0 : i32
    return %c0_i32, %c0_i32_0 : i32, i32
  }
  func.func @transform_2(%arg0: i32) -> (i32, i32) {
    %c0_i32 = arith.constant 0 : i32
    %c0_i32_0 = arith.constant 0 : i32
    %c0_i32_1 = arith.constant 0 : i32
    return %c0_i32, %c0_i32_0 : i32, i32
  }
  func.func @transform_3(%arg0: i32) -> (i32, i32) {
    %c0_i32 = arith.constant 0 : i32
    %c0_i32_0 = arith.constant 0 : i32
    %c0_i32_1 = arith.constant 0 : i32
    return %c0_i32, %c0_i32_0 : i32, i32
  }
  func.func @transform_4(%arg0: i32) -> (i32, i32) {
    %c0_i32 = arith.constant 0 : i32
    %c0_i32_0 = arith.constant 0 : i32
    %c0_i32_1 = arith.constant 0 : i32
    return %c0_i32, %c0_i32_0 : i32, i32
  }
  func.func @transform_5(%arg0: i32) -> (i32, i32) {
    %c0_i32 = arith.constant 0 : i32
    %c0_i32_0 = arith.constant 0 : i32
    %c0_i32_1 = arith.constant 0 : i32
    return %c0_i32, %c0_i32_0 : i32, i32
  }
  func.func @transform_6(%arg0: i32) -> (i32, i32) {
    %c0_i32 = arith.constant 0 : i32
    %c0_i32_0 = arith.constant 0 : i32
    %c0_i32_1 = arith.constant 0 : i32
    return %c0_i32, %c0_i32_0 : i32, i32
  }
  func.func @transform_7(%arg0: i32) -> (i32, i32) {
    %c0_i32 = arith.constant 0 : i32
    %c0_i32_0 = arith.constant 0 : i32
    %c0_i32_1 = arith.constant 0 : i32
    return %c0_i32, %c0_i32_0 : i32, i32
  }
  func.func @transform_8(%arg0: i32) -> (i32, i32) {
    %c0_i32 = arith.constant 0 : i32
    %c0_i32_0 = arith.constant 0 : i32
    %c0_i32_1 = arith.constant 0 : i32
    return %c0_i32, %c0_i32_0 : i32, i32
  }
  func.func @transform_9(%arg0: i32) -> (i32, i32) {
    %c0_i32 = arith.constant 0 : i32
    %c0_i32_0 = arith.constant 0 : i32
    return %arg0, %c0_i32 : i32, i32
  }
  func.func @transform_10(%arg0: i32) -> (i32, i32) {
    %c0_i32 = arith.constant 0 : i32
    %c0_i32_0 = arith.constant 0 : i32
    return %arg0, %c0_i32 : i32, i32
  }
}

</mosaic_0001>

<bundles_post_ra>
// kernel: tpu_custom_call.1
= control target key start
LH: loop header
LB: loop body
LE: loop exit
PB: predicated region body
PF: predicated region fallthrough
CT: control target
= control target key end

     0   :  { %16 = vsyncpa [#allocation3], 0  ;;  %s1215_s0 = inlined_call_operand.hbm [shape: f32[8,128], index: 0, kind: input, shape index: {}]   ;;  %s1216_s1 = inlined_call_operand.hbm [shape: f32[128,256], index: 1, kind: input, shape index: {}]   ;;  %s1217_s2 = inlined_call_operand.vmem [shape: f32[1,256], index: 2, kind: input, shape index: {}]   ;;  %s1218_s3 = inlined_call_operand.hbm [shape: f32[256,256], index: 3, kind: input, shape index: {}]   ;;  %s1219_s4 = inlined_call_operand.vmem [shape: f32[1,256], index: 4, kind: input, shape index: {}]   ;;  %s1220_s5 = inlined_call_operand.hbm [shape: f32[256,128], index: 5, kind: input, shape index: {}]   ;;  %s1221_s6 = inlined_call_operand.vmem [shape: f32[1,128], index: 6, kind: input, shape index: {}]   ;;  %s1222_s7 = inlined_call_operand.hbm [shape: f32[256,128], index: 7, kind: input, shape index: {}]   ;;  %s1223_s8 = inlined_call_operand.vmem [shape: f32[1,128], index: 8, kind: input, shape index: {}]   ;;  %s1224_s9 = inlined_call_operand.hbm [shape: f32[8,128], index: 9, kind: output, shape index: {0}]   ;;  %s1225_s10 = inlined_call_operand.hbm [shape: f32[8,128], index: 10, kind: output, shape index: {1}]  }
   0x1   :  { %17 = vsyncpa [#allocation6], 0 }
   0x2   :  { %18 = vsyncpa [#allocation9], 0 }
   0x3   :  { %19 = vsyncpa [#allocation4], 0 }
   0x4   :  { %20 = vsyncpa [#allocation13], 0  ;;  %s1030_s13 = smov [#allocation5]   ;;  %s866_s17 = scalar_lea.hbm %s1216_s1, 4096 }
   0x5   :  { %s36_s14 = sshll.u32 %s1030_s13, 4  ;;  %p867_p0 = scmp.ne.s32.totalorder %s1216_s1, %s866_s17  ;;  %s37_s14 = int_to_ptr.vmem [resolvable:$true] %s36_s14 }
   0x6   :  { %p870_p1 = scmp.lt.u32.totalorder %s866_s17, %s1216_s1 }
   0x8   :  { %p872_p2 = pnand %p870_p1, %p867_p0 }
   0xa   :  { %875 = shalt.err (!%p872_p2)
}
   0xb   :  { %s876_s22 = scalar_lea.vmem %s37_s14, 4096  ;;  %p881_p4 = scmp.lt.s32.totalorder %s37_s14, %s37_s14 }
   0xc   :  { %p877_p3 = scmp.ne.s32.totalorder %s37_s14, %s876_s22  ;;  %p882_p5 = scmp.lt.s32.totalorder %s876_s22, %s876_s22 }
   0xe   :  { %p883_p6 = por %p882_p5, %p881_p4 }
  0x10   :  { %p884_p7 = pnand %p883_p6, %p877_p3 }
  0x12   :  { %887 = shalt.err (!%p884_p7)
}
  0x13   :  { %s1031_s23 = smov 256   ;;  %s1032_s24 = smov 16  }
  0x14   :  { %42 = dma.hbm_to_vmem [thread:$0]  %s1216_s1, 4096, %s37_s14, [#allocation6], %s1031_s23, %s1031_s23, %s1032_s24  }
  0x15   :  { %s1033_s27 = smov [#allocation8]   ;;  %s888_s11 = scalar_lea.hbm %s1220_s5, 4096 }
  0x16   :  { %s64_s28 = sshll.u32 %s1033_s27, 4  ;;  %p889_p8 = scmp.ne.s32.totalorder %s1220_s5, %s888_s11  ;;  %s65_s28 = int_to_ptr.vmem [resolvable:$true] %s64_s28 }
  0x17   :  { %p892_p9 = scmp.lt.u32.totalorder %s888_s11, %s1220_s5 }
  0x19   :  { %p894_p10 = pnand %p892_p9, %p889_p8 }
  0x1b   :  { %897 = shalt.err (!%p894_p10)
}
  0x1c   :  { %s898_s17 = scalar_lea.vmem %s65_s28, 4096  ;;  %p903_p12 = scmp.lt.s32.totalorder %s65_s28, %s65_s28 }
  0x1d   :  { %p899_p11 = scmp.ne.s32.totalorder %s65_s28, %s898_s17  ;;  %p904_p13 = scmp.lt.s32.totalorder %s898_s17, %s898_s17 }
  0x1f   :  { %p905_p0 = por %p904_p13, %p903_p12 }
  0x21   :  { %p906_p1 = pnand %p905_p0, %p899_p11 }
  0x23   :  { %909 = shalt.err (!%p906_p1)
}
  0x24   :  { %s1034_s1 = smov 128   ;;  %s1035_s14 = smov 8  }
  0x25   :  { %70 = dma.hbm_to_vmem [thread:$0]  %s1220_s5, 4096, %s65_s28, [#allocation9], %s1034_s1, %s1034_s1, %s1035_s14  }
  0x26   :  { %s1036_s20 = smov [#allocation2]   ;;  %s1037_s22 = smov [#allocation7]  }
  0x27   :  { %s27_s21 = sshll.u32 %s1036_s20, 4  ;;  %s50_s25 = sshll.u32 %s1037_s22, 4  ;;  %s28_s21 = int_to_ptr.vmem [resolvable:$true] %s27_s21  ;;  %s1127_s25 = int_to_ptr.vmem [resolvable:$true] %s50_s25 }
  0x28   :  { %s910_s29 = scalar_lea.hbm %s1215_s0, 128 }
  0x29   :  { %p911_p2 = scmp.ne.s32.totalorder %s1215_s0, %s910_s29  ;;  %p914_p3 = scmp.lt.u32.totalorder %s910_s29, %s1215_s0 }
  0x2b   :  { %p916_p4 = pnand %p914_p3, %p911_p2 }
  0x2d   :  { %919 = shalt.err (!%p916_p4)
}
  0x2e   :  { %s920_s5 = scalar_lea.vmem %s28_s21, 128  ;;  %p925_p6 = scmp.lt.s32.totalorder %s28_s21, %s28_s21 }
  0x2f   :  { %p921_p5 = scmp.ne.s32.totalorder %s28_s21, %s920_s5  ;;  %p926_p7 = scmp.lt.s32.totalorder %s920_s5, %s920_s5 }
  0x31   :  { %p927_p8 = por %p926_p7, %p925_p6 }
  0x33   :  { %p928_p9 = pnand %p927_p8, %p921_p5 }
  0x35   :  { %931 = shalt.err (!%p928_p9)
}
  0x36   :  { %30 = dma.hbm_to_vmem [thread:$0]  %s1215_s0, 128, %s28_s21, [#allocation3]  }
  0x37   :  { %s932_s18 = scalar_lea.hbm %s1218_s3, 8192 }
  0x38   :  { %p933_p10 = scmp.ne.s32.totalorder %s1218_s3, %s932_s18  ;;  %p936_p11 = scmp.lt.u32.totalorder %s932_s18, %s1218_s3 }
  0x3a   :  { %p938_p12 = pnand %p936_p11, %p933_p10 }
  0x3c   :  { %941 = shalt.err (!%p938_p12)
}
  0x3d   :  { %s942_s27 = scalar_lea.vmem %s1127_s25, 8192  ;;  %p947_p0 = scmp.lt.s32.totalorder %s1127_s25, %s1127_s25 }
  0x3e   :  { %p943_p13 = scmp.ne.s32.totalorder %s1127_s25, %s942_s27  ;;  %p948_p1 = scmp.lt.s32.totalorder %s942_s27, %s942_s27 }
  0x40   :  { %p949_p2 = por %p948_p1, %p947_p0 }
  0x42   :  { %p950_p3 = pnand %p949_p2, %p943_p13 }
  0x44   :  { %953 = shalt.err (!%p950_p3)
}
  0x45   :  { %56 = dma.hbm_to_vmem [thread:$0]  %s1218_s3, 8192, %s1127_s25, [#allocation6], %s1031_s23, %s1031_s23, %s1032_s24  }
  0x46   :  { %s1038_s29 = smov [#allocation10]   ;;  %s954_s13 = scalar_lea.hbm %s1222_s7, 4096 }
  0x47   :  { %s78_s30 = sshll.u32 %s1038_s29, 4  ;;  %p955_p4 = scmp.ne.s32.totalorder %s1222_s7, %s954_s13  ;;  %s79_s30 = int_to_ptr.vmem [resolvable:$true] %s78_s30 }
  0x48   :  { %p958_p5 = scmp.lt.u32.totalorder %s954_s13, %s1222_s7 }
  0x4a   :  { %p960_p6 = pnand %p958_p5, %p955_p4 }
  0x4c   :  { %963 = shalt.err (!%p960_p6)
}
  0x4d   :  { %s964_s17 = scalar_lea.vmem %s79_s30, 4096  ;;  %p969_p8 = scmp.lt.s32.totalorder %s79_s30, %s79_s30 }
  0x4e   :  { %p965_p7 = scmp.ne.s32.totalorder %s79_s30, %s964_s17  ;;  %p970_p9 = scmp.lt.s32.totalorder %s964_s17, %s964_s17 }
  0x50   :  { %p971_p10 = por %p970_p9, %p969_p8 }
  0x52   :  { %p972_p11 = pnand %p971_p10, %p965_p7 }
  0x54   :  { %975 = shalt.err (!%p972_p11)
}
  0x55   :  { %84 = dma.hbm_to_vmem [thread:$0]  %s1222_s7, 4096, %s79_s30, [#allocation9], %s1034_s1, %s1034_s1, %s1035_s14  }
  0x56   :  { %1020 = dma.done.wait [#allocation3], 128  }
  0x57   :  { %1021 = vsyncadd [#allocation3], 4294967168 }
  0x58   :  { %1022 = dma.done.wait [#allocation6], 12288  }
  0x59   :  { %1023 = vsyncadd [#allocation6], 4294955008 }
  0x5a   :  { %1024 = dma.done.wait [#allocation9], 8192  }
  0x5b   :  { %1025 = vsyncadd [#allocation9], 4294959104  ;;  %v1039_v0 = vmov 0.0   ;;  %v104_v1 = vld [vmem:[#allocation5 + $0x8] sm:$0xff]  ;;  %v106_v2 = vld [vmem:[#allocation5 + $0x18] sm:$0xff]  ;;  %s1040_s25 = smov [#allocation11]  }
  0x5c   :  { %211 = vmatprep.mubr.f32.mxu0 %v1039_v0  ;;  %v103_v3 = vld [vmem:[#allocation5] sm:$0xff]  ;;  %v694_v4 = vpack.c.bf16 %v106_v2, %v104_v1  ;;  %v105_v5 = vld [vmem:[#allocation5 + $0x10] sm:$0xff]  ;;  %v108_v6 = vld [vmem:[#allocation5 + $0x28] sm:$0xff]  ;;  %s597_s18 = sshll.u32 %s1040_s25, 4  ;;  %s598_s18 = int_to_ptr.vmem [resolvable:$true] %s597_s18 }
  0x5d   :  { %v110_v7 = vld [vmem:[#allocation5 + $0x38] sm:$0xff]  ;;  %v696_v8 = vpack.c.bf16 %v105_v5, %v103_v3  ;;  %v107_v10 = vld [vmem:[#allocation5 + $0x20] sm:$0xff]  ;;  %v109_v11 = vld [vmem:[#allocation5 + $0x30] sm:$0xff]  ;;  %s976_s19 = scalar_lea.vmem %s598_s18, 128  ;;  %p981_p13 = scmp.lt.s32.totalorder %s598_s18, %s598_s18 }
  0x5e   :  { %v698_v9 = vpack.c.bf16 %v110_v7, %v108_v6  ;;  %v112_v12 = vld [vmem:[#allocation5 + $0x48] sm:$0xff]  ;;  %695 = vmatprep.subr.bf16.mxu0 %v694_v4  ;;  %v114_v13 = vld [vmem:[#allocation5 + $0x58] sm:$0xff]  ;;  %v700_v14 = vpack.c.bf16 %v109_v11, %v107_v10  ;;  %v111_v16 = vld [vmem:[#allocation5 + $0x40] sm:$0xff]  ;;  %p977_p12 = scmp.ne.s32.totalorder %s598_s18, %s976_s19  ;;  %p982_p0 = scmp.lt.s32.totalorder %s976_s19, %s976_s19 }
  0x5f   :  { %697 = vmatpush1.bf16.msra.mxu0 %v696_v8  ;;  %v702_v15 = vpack.c.bf16 %v114_v13, %v112_v12  ;;  %v113_v17 = vld [vmem:[#allocation5 + $0x50] sm:$0xff]  ;;  %v116_v18 = vld [vmem:[#allocation5 + $0x68] sm:$0xff]  ;;  %v118_v19 = vld [vmem:[#allocation5 + $0x78] sm:$0xff] }
  0x60   :  { %699 = vmatprep.subr.bf16.mxu0 %v698_v9  ;;  %v704_v20 = vpack.c.bf16 %v113_v17, %v111_v16  ;;  %v706_v21 = vpack.c.bf16 %v118_v19, %v116_v18  ;;  %v115_v22 = vld [vmem:[#allocation5 + $0x60] sm:$0xff]  ;;  %v117_v23 = vld [vmem:[#allocation5 + $0x70] sm:$0xff]  ;;  %v120_v24 = vld [vmem:[#allocation5 + $0x88] sm:$0xff]  ;;  %p983_p1 = por %p982_p0, %p981_p13 }
  0x61   :  { %v122_v25 = vld [vmem:[#allocation5 + $0x98] sm:$0xff]  ;;  %v119_v26 = vld [vmem:[#allocation5 + $0x80] sm:$0xff]  ;;  %v121_v27 = vld [vmem:[#allocation5 + $0x90] sm:$0xff]  ;;  %v708_v31 = vpack.c.bf16 %v117_v23, %v115_v22 }
  0x62   :  { %v221_v28 = vld [vmem:[#allocation7 + $0x8] sm:$0xff]  ;;  %v223_v29 = vld [vmem:[#allocation7 + $0x18] sm:$0xff]  ;;  %v220_v30 = vld [vmem:[#allocation7] sm:$0xff]  ;;  %v710_v36 = vpack.c.bf16 %v122_v25, %v120_v24  ;;  %v712_v46 = vpack.c.bf16 %v121_v27, %v119_v26  ;;  %p984_p2 = pnand %p983_p1, %p977_p12 }
  0x63   :  { %701 = vmatpush1.bf16.msra.mxu0 %v700_v14  ;;  %v726_v32 = vpack.c.bf16 %v223_v29, %v221_v28  ;;  %v222_v33 = vld [vmem:[#allocation7 + $0x10] sm:$0xff]  ;;  %v225_v34 = vld [vmem:[#allocation7 + $0x28] sm:$0xff]  ;;  %v227_v35 = vld [vmem:[#allocation7 + $0x38] sm:$0xff] }
  0x64   :  { %703 = vmatprep.subr.bf16.mxu0 %v702_v15  ;;  %v728_v37 = vpack.c.bf16 %v222_v33, %v220_v30  ;;  %v730_v38 = vpack.c.bf16 %v227_v35, %v225_v34  ;;  %v224_v39 = vld [vmem:[#allocation7 + $0x20] sm:$0xff]  ;;  %v226_v40 = vld [vmem:[#allocation7 + $0x30] sm:$0xff]  ;;  %v229_v41 = vld [vmem:[#allocation7 + $0x48] sm:$0xff] }
  0x65   :  { %v124_v42 = vld [vmem:[#allocation5 + $0xa8] sm:$0xff]  ;;  %v126_v43 = vld [vmem:[#allocation5 + $0xb8] sm:$0xff]  ;;  %727 = vmatprep.subr.bf16.mxu1 %v726_v32  ;;  %v732_v45 = vpack.c.bf16 %v226_v40, %v224_v39  ;;  %v123_v47 = vld [vmem:[#allocation5 + $0xa0] sm:$0xff] }
  0x66   :  { %v231_v44 = vld [vmem:[#allocation7 + $0x58] sm:$0xff]  ;;  %729 = vmatpush1.bf16.msra.mxu1 %v728_v37  ;;  %v228_v49 = vld [vmem:[#allocation7 + $0x40] sm:$0xff]  ;;  %v230_v50 = vld [vmem:[#allocation7 + $0x50] sm:$0xff]  ;;  %v714_v51 = vpack.c.bf16 %v126_v43, %v124_v42 }
  0x67   :  { %705 = vmatpush1.bf16.msra.mxu0 %v704_v20  ;;  %731 = vmatprep.subr.bf16.mxu1 %v730_v38  ;;  %v734_v48 = vpack.c.bf16 %v231_v44, %v229_v41  ;;  %v125_v52 = vld [vmem:[#allocation5 + $0xb0] sm:$0xff]  ;;  %v233_v53 = vld [vmem:[#allocation7 + $0x68] sm:$0xff]  ;;  %v235_v54 = vld [vmem:[#allocation7 + $0x78] sm:$0xff]  ;;  %v736_v57 = vpack.c.bf16 %v230_v50, %v228_v49 }
  0x68   :  { %707 = vmatprep.subr.bf16.mxu0 %v706_v21  ;;  %v128_v55 = vld [vmem:[#allocation5 + $0xc8] sm:$0xff]  ;;  %v130_v56 = vld [vmem:[#allocation5 + $0xd8] sm:$0xff]  ;;  %v716_v58 = vpack.c.bf16 %v125_v52, %v123_v47  ;;  %v127_v59 = vld [vmem:[#allocation5 + $0xc0] sm:$0xff]  ;;  %v738_v60 = vpack.c.bf16 %v235_v54, %v233_v53 }
  0x69   :  { %v232_v61 = vld [vmem:[#allocation7 + $0x60] sm:$0xff]  ;;  %v234_v62 = vld [vmem:[#allocation7 + $0x70] sm:$0xff]  ;;  %v718_v63 = vpack.c.bf16 %v130_v56, %v128_v55  ;;  %v237_v1 = vld [vmem:[#allocation7 + $0x88] sm:$0xff] }
  0x6a   :  { %733 = vmatpush1.bf16.msra.mxu1 %v732_v45  ;;  %v129_v0 = vld [vmem:[#allocation5 + $0xd0] sm:$0xff]  ;;  %v239_v2 = vld [vmem:[#allocation7 + $0x98] sm:$0xff]  ;;  %v132_v3 = vld [vmem:[#allocation5 + $0xe8] sm:$0xff]  ;;  %v740_v5 = vpack.c.bf16 %v234_v62, %v232_v61 }
  0x6b   :  { %709 = vmatpush1.bf16.msra.mxu0 %v708_v31  ;;  %735 = vmatprep.subr.bf16.mxu1 %v734_v48  ;;  %v134_v4 = vld [vmem:[#allocation5 + $0xf8] sm:$0xff]  ;;  %v720_v6 = vpack.c.bf16 %v129_v0, %v127_v59  ;;  %v131_v7 = vld [vmem:[#allocation5 + $0xe0] sm:$0xff]  ;;  %v742_v8 = vpack.c.bf16 %v239_v2, %v237_v1  ;;  %v238_v10 = vld [vmem:[#allocation7 + $0x90] sm:$0xff] }
  0x6c   :  { %711 = vmatprep.subr.bf16.mxu0 %v710_v36  ;;  %v236_v9 = vld [vmem:[#allocation7 + $0x80] sm:$0xff]  ;;  %v722_v11 = vpack.c.bf16 %v134_v4, %v132_v3  ;;  %v133_v12 = vld [vmem:[#allocation5 + $0xf0] sm:$0xff]  ;;  %v241_v13 = vld [vmem:[#allocation7 + $0xa8] sm:$0xff] }
  0x6d   :  { %v243_v14 = vld [vmem:[#allocation7 + $0xb8] sm:$0xff]  ;;  %v744_v15 = vpack.c.bf16 %v238_v10, %v236_v9  ;;  %v724_v16 = vpack.c.bf16 %v133_v12, %v131_v7  ;;  %v240_v18 = vld [vmem:[#allocation7 + $0xa0] sm:$0xff]  ;;  %v242_v19 = vld [vmem:[#allocation7 + $0xb0] sm:$0xff] }
  0x6e   :  { %737 = vmatpush1.bf16.msra.mxu1 %v736_v57  ;;  %v746_v17 = vpack.c.bf16 %v243_v14, %v241_v13  ;;  %v245_v20 = vld [vmem:[#allocation7 + $0xc8] sm:$0xff]  ;;  %v247_v21 = vld [vmem:[#allocation7 + $0xd8] sm:$0xff]  ;;  %v748_v22 = vpack.c.bf16 %v242_v19, %v240_v18  ;;  %v244_v25 = vld [vmem:[#allocation7 + $0xc0] sm:$0xff] }
  0x6f   :  { %713 = vmatpush1.bf16.msra.mxu0 %v712_v46  ;;  %739 = vmatprep.subr.bf16.mxu1 %v738_v60  ;;  %v102_v23 = vld [vmem:[#allocation2] sm:$0xff]  ;;  %v750_v24 = vpack.c.bf16 %v247_v21, %v245_v20  ;;  %v246_v26 = vld [vmem:[#allocation7 + $0xd0] sm:$0xff]  ;;  %v249_v27 = vld [vmem:[#allocation7 + $0xe8] sm:$0xff] }
  0x70   :  { %715 = vmatprep.subr.bf16.mxu0 %v714_v51  ;;  %v251_v28 = vld [vmem:[#allocation7 + $0xf8] sm:$0xff]  ;;  %v752_v29 = vpack.c.bf16 %v246_v26, %v244_v25  ;;  %v248_v31 = vld [vmem:[#allocation7 + $0xe0] sm:$0xff]  ;;  %v250_v32 = vld [vmem:[#allocation7 + $0xf0] sm:$0xff] }
  0x71   :  { %v754_v30 = vpack.c.bf16 %v251_v28, %v249_v27  ;;  %v253_v33 = vld [vmem:[#allocation7 + $0x108] sm:$0xff]  ;;  %v255_v34 = vld [vmem:[#allocation7 + $0x118] sm:$0xff]  ;;  %v756_v35 = vpack.c.bf16 %v250_v32, %v248_v31  ;;  %v252_v37 = vld [vmem:[#allocation7 + $0x100] sm:$0xff] }
  0x72   :  { %741 = vmatpush1.bf16.msra.mxu1 %v740_v5  ;;  %v758_v36 = vpack.c.bf16 %v255_v34, %v253_v33  ;;  %v254_v38 = vld [vmem:[#allocation7 + $0x110] sm:$0xff]  ;;  %v257_v39 = vld [vmem:[#allocation7 + $0x128] sm:$0xff]  ;;  %v259_v40 = vld [vmem:[#allocation7 + $0x138] sm:$0xff] }
  0x73   :  { %717 = vmatpush1.bf16.msra.mxu0 %v716_v58  ;;  %743 = vmatprep.subr.bf16.mxu1 %v742_v8  ;;  %v760_v41 = vpack.c.bf16 %v254_v38, %v252_v37  ;;  %v762_v42 = vpack.c.bf16 %v259_v40, %v257_v39  ;;  %v256_v43 = vld [vmem:[#allocation7 + $0x120] sm:$0xff]  ;;  %v258_v44 = vld [vmem:[#allocation7 + $0x130] sm:$0xff]  ;;  %v261_v45 = vld [vmem:[#allocation7 + $0x148] sm:$0xff] }
  0x74   :  { %719 = vmatprep.subr.bf16.mxu0 %v718_v63  ;;  %v263_v46 = vld [vmem:[#allocation7 + $0x158] sm:$0xff]  ;;  %v764_v47 = vpack.c.bf16 %v258_v44, %v256_v43  ;;  %v260_v49 = vld [vmem:[#allocation7 + $0x140] sm:$0xff]  ;;  %v262_v50 = vld [vmem:[#allocation7 + $0x150] sm:$0xff] }
  0x75   :  { %v766_v48 = vpack.c.bf16 %v263_v46, %v261_v45  ;;  %v265_v51 = vld [vmem:[#allocation7 + $0x168] sm:$0xff]  ;;  %v267_v52 = vld [vmem:[#allocation7 + $0x178] sm:$0xff]  ;;  %v768_v53 = vpack.c.bf16 %v262_v50, %v260_v49  ;;  %v264_v55 = vld [vmem:[#allocation7 + $0x160] sm:$0xff] }
  0x76   :  { %745 = vmatpush1.bf16.msra.mxu1 %v744_v15  ;;  %v770_v54 = vpack.c.bf16 %v267_v52, %v265_v51  ;;  %v266_v56 = vld [vmem:[#allocation7 + $0x170] sm:$0xff]  ;;  %v269_v57 = vld [vmem:[#allocation7 + $0x188] sm:$0xff]  ;;  %v271_v58 = vld [vmem:[#allocation7 + $0x198] sm:$0xff] }
  0x77   :  { %721 = vmatpush1.bf16.msra.mxu0 %v720_v6  ;;  %747 = vmatprep.subr.bf16.mxu1 %v746_v17  ;;  %v772_v59 = vpack.c.bf16 %v266_v56, %v264_v55  ;;  %v774_v60 = vpack.c.bf16 %v271_v58, %v269_v57  ;;  %v268_v61 = vld [vmem:[#allocation7 + $0x180] sm:$0xff]  ;;  %v270_v62 = vld [vmem:[#allocation7 + $0x190] sm:$0xff]  ;;  %v273_v63 = vld [vmem:[#allocation7 + $0x1a8] sm:$0xff] }
  0x78   :  { %723 = vmatprep.subr.bf16.mxu0 %v722_v11  ;;  %v275_v0 = vld [vmem:[#allocation7 + $0x1b8] sm:$0xff]  ;;  %v776_v1 = vpack.c.bf16 %v270_v62, %v268_v61  ;;  %v272_v3 = vld [vmem:[#allocation7 + $0x1a0] sm:$0xff]  ;;  %v274_v4 = vld [vmem:[#allocation7 + $0x1b0] sm:$0xff] }
  0x79   :  { %v778_v2 = vpack.c.bf16 %v275_v0, %v273_v63  ;;  %v277_v5 = vld [vmem:[#allocation7 + $0x1c8] sm:$0xff]  ;;  %v279_v6 = vld [vmem:[#allocation7 + $0x1d8] sm:$0xff]  ;;  %v780_v7 = vpack.c.bf16 %v274_v4, %v272_v3  ;;  %v276_v9 = vld [vmem:[#allocation7 + $0x1c0] sm:$0xff] }
  0x7a   :  { %749 = vmatpush1.bf16.msra.mxu1 %v748_v22  ;;  %v782_v8 = vpack.c.bf16 %v279_v6, %v277_v5  ;;  %v278_v10 = vld [vmem:[#allocation7 + $0x1d0] sm:$0xff]  ;;  %v281_v12 = vld [vmem:[#allocation7 + $0x1e8] sm:$0xff]  ;;  %v283_v13 = vld [vmem:[#allocation7 + $0x1f8] sm:$0xff] }
  0x7b   :  { %725 = vmatpush1.bf16.msra.mxu0 %v724_v16  ;;  %751 = vmatprep.subr.bf16.mxu1 %v750_v24  ;;  %v784_v11 = vpack.c.bf16 %v278_v10, %v276_v9  ;;  %v786_v14 = vpack.c.bf16 %v283_v13, %v281_v12  ;;  %v280_v15 = vld [vmem:[#allocation7 + $0x1e0] sm:$0xff]  ;;  %v282_v16 = vld [vmem:[#allocation7 + $0x1f0] sm:$0xff]  ;;  %v386_v19 = vld [vmem:[#allocation8 + $0x88] sm:$0xff] }
  0x7c   :  { %v788_v17 = vpack.c.bf16 %v282_v16, %v280_v15  ;;  %v385_v18 = vld [vmem:[#allocation8 + $0x80] sm:$0xff]  ;;  %v370_v22 = vld [vmem:[#allocation8 + $0x8] sm:$0xff]  ;;  %v388_v24 = vld [vmem:[#allocation8 + $0x98] sm:$0xff] }
  0x7d   :  { %v369_v20 = vld [vmem:[#allocation8] sm:$0xff]  ;;  %v790_v21 = vpack.c.bf16 %v386_v19, %v385_v18  ;;  %v371_v27 = vld [vmem:[#allocation8 + $0x10] sm:$0xff]  ;;  %v372_v28 = vld [vmem:[#allocation8 + $0x18] sm:$0xff] }
  0x7e   :  { %212 = vmatmul.mubr.f32.vlgmr.msra.gmra.mrb[0].mxu0 %v102_v23  ;;  %753 = vmatpush1.bf16.msra.mxu1 %v752_v29  ;;  %v387_v23 = vld [vmem:[#allocation8 + $0x90] sm:$0xff]  ;;  %v792_v25 = vpack.c.bf16 %v370_v22, %v369_v20  ;;  %v389_v29 = vld [vmem:[#allocation8 + $0xa0] sm:$0xff]  ;;  %v796_v31 = vpack.c.bf16 %v372_v28, %v371_v27  ;;  %v374_v34 = vld [vmem:[#allocation8 + $0x28] sm:$0xff] }
  0x7f   :  { %755 = vmatprep.subr.bf16.mxu1 %v754_v30  ;;  %v794_v26 = vpack.c.bf16 %v388_v24, %v387_v23  ;;  %791 = vmatprep.subr.bf16.mxu0 %v790_v21  ;;  %v390_v30 = vld [vmem:[#allocation8 + $0xa8] sm:$0xff]  ;;  %v373_v33 = vld [vmem:[#allocation8 + $0x20] sm:$0xff]  ;;  %v375_v39 = vld [vmem:[#allocation8 + $0x30] sm:$0xff] }
  0x80   :  { %793 = vmatpush3.bf16.msra.mxu0 %v792_v25  ;;  %v798_v32 = vpack.c.bf16 %v390_v30, %v389_v29  ;;  %v800_v37 = vpack.c.bf16 %v374_v34, %v373_v33  ;;  %v376_v40 = vld [vmem:[#allocation8 + $0x38] sm:$0xff]  ;;  %v377_v45 = vld [vmem:[#allocation8 + $0x40] sm:$0xff]  ;;  %v378_v46 = vld [vmem:[#allocation8 + $0x48] sm:$0xff] }
  0x81   :  { %795 = vmatprep.subr.bf16.mxu0 %v794_v26  ;;  %v804_v43 = vpack.c.bf16 %v376_v40, %v375_v39  ;;  %v808_v49 = vpack.c.bf16 %v378_v46, %v377_v45  ;;  %v379_v51 = vld [vmem:[#allocation8 + $0x50] sm:$0xff]  ;;  %v380_v52 = vld [vmem:[#allocation8 + $0x58] sm:$0xff]  ;;  %v381_v57 = vld [vmem:[#allocation8 + $0x60] sm:$0xff] }
  0x82   :  { %757 = vmatpush1.bf16.msra.mxu1 %v756_v35  ;;  %v391_v35 = vld [vmem:[#allocation8 + $0xb0] sm:$0xff]  ;;  %v812_v55 = vpack.c.bf16 %v380_v52, %v379_v51  ;;  %v382_v58 = vld [vmem:[#allocation8 + $0x68] sm:$0xff]  ;;  %v135_v63 = vld [vmem:[%s1217_s2] sm:$0x3] }
  0x83   :  { %759 = vmatprep.subr.bf16.mxu1 %v758_v36  ;;  %v392_v36 = vld [vmem:[#allocation8 + $0xb8] sm:$0xff]  ;;  %v399_v9 = vld [vmem:[#allocation8 + $0xf0] sm:$0xff]  ;;  %v495_v15 = vld [vmem:[#allocation10 + $0x80] sm:$0xff] }
  0x84   :  { %797 = vmatpush3.bf16.msra.mxu0 %v796_v31  ;;  %v802_v38 = vpack.c.bf16 %v392_v36, %v391_v35  ;;  %v400_v10 = vld [vmem:[#allocation8 + $0xf8] sm:$0xff]  ;;  %v383_v12 = vld [vmem:[#allocation8 + $0x70] sm:$0xff]  ;;  %v496_v16 = vld [vmem:[#allocation10 + $0x88] sm:$0xff] }
  0x85   :  { %799 = vmatprep.subr.bf16.mxu0 %v798_v32  ;;  %v384_v13 = vld [vmem:[#allocation8 + $0x78] sm:$0xff]  ;;  %v479_v24 = vld [vmem:[#allocation10] sm:$0xff]  ;;  %v480_v25 = vld [vmem:[#allocation10 + $0x8] sm:$0xff] }
  0x86   :  { %761 = vmatpush1.bf16.msra.mxu1 %v760_v41  ;;  %v393_v41 = vld [vmem:[#allocation8 + $0xc0] sm:$0xff]  ;;  %v284_v18 = vld [vmem:[%s1219_s4] sm:$0x3]  ;;  %v497_v27 = vld [vmem:[#allocation10 + $0x90] sm:$0xff]  ;;  %v824_v30 = vpack.c.bf16 %v480_v25, %v479_v24 }
  0x87   :  { %763 = vmatprep.subr.bf16.mxu1 %v762_v42  ;;  %v394_v42 = vld [vmem:[#allocation8 + $0xc8] sm:$0xff]  ;;  %v498_v28 = vld [vmem:[#allocation10 + $0x98] sm:$0xff]  ;;  %v481_v33 = vld [vmem:[#allocation10 + $0x10] sm:$0xff] }
  0x88   :  { %801 = vmatpush3.bf16.msra.mxu0 %v800_v37  ;;  %v806_v44 = vpack.c.bf16 %v394_v42, %v393_v41  ;;  %v826_v32 = vpack.c.bf16 %v498_v28, %v497_v27  ;;  %v482_v34 = vld [vmem:[#allocation10 + $0x18] sm:$0xff]  ;;  %v499_v35 = vld [vmem:[#allocation10 + $0xa0] sm:$0xff]  ;;  %v500_v36 = vld [vmem:[#allocation10 + $0xa8] sm:$0xff] }
  0x89   :  { %803 = vmatprep.subr.bf16.mxu0 %v802_v38  ;;  %v828_v37 = vpack.c.bf16 %v482_v34, %v481_v33  ;;  %v830_v38 = vpack.c.bf16 %v500_v36, %v499_v35  ;;  %v483_v39 = vld [vmem:[#allocation10 + $0x20] sm:$0xff]  ;;  %v484_v40 = vld [vmem:[#allocation10 + $0x28] sm:$0xff]  ;;  %v501_v41 = vld [vmem:[#allocation10 + $0xb0] sm:$0xff] }
  0x8a   :  { %765 = vmatpush1.bf16.msra.mxu1 %v764_v47  ;;  %v395_v47 = vld [vmem:[#allocation8 + $0xd0] sm:$0xff]  ;;  %v502_v42 = vld [vmem:[#allocation10 + $0xb8] sm:$0xff]  ;;  %v487_v51 = vld [vmem:[#allocation10 + $0x40] sm:$0xff] }
  0x8b   :  { %767 = vmatprep.subr.bf16.mxu1 %v766_v48  ;;  %v396_v48 = vld [vmem:[#allocation8 + $0xd8] sm:$0xff]  ;;  %v485_v45 = vld [vmem:[#allocation10 + $0x30] sm:$0xff]  ;;  %v488_v52 = vld [vmem:[#allocation10 + $0x48] sm:$0xff] }
  0x8c   :  { %805 = vmatpush3.bf16.msra.mxu0 %v804_v43  ;;  %v810_v50 = vpack.c.bf16 %v396_v48, %v395_v47  ;;  %v832_v43 = vpack.c.bf16 %v484_v40, %v483_v39  ;;  %v486_v46 = vld [vmem:[#allocation10 + $0x38] sm:$0xff]  ;;  %v503_v47 = vld [vmem:[#allocation10 + $0xc0] sm:$0xff]  ;;  %v504_v48 = vld [vmem:[#allocation10 + $0xc8] sm:$0xff] }
  0x8d   :  { %807 = vmatprep.subr.bf16.mxu0 %v806_v44  ;;  %v834_v44 = vpack.c.bf16 %v502_v42, %v501_v41 }
  0x8e   :  { %769 = vmatpush1.bf16.msra.mxu1 %v768_v53  ;;  %v397_v53 = vld [vmem:[#allocation8 + $0xe0] sm:$0xff] }
  0x8f   :  { %771 = vmatprep.subr.bf16.mxu1 %v770_v54  ;;  %v398_v54 = vld [vmem:[#allocation8 + $0xe8] sm:$0xff] }
  0x90   :  { %809 = vmatpush3.bf16.msra.mxu0 %v808_v49  ;;  %v814_v56 = vpack.c.bf16 %v398_v54, %v397_v53  ;;  %v836_v49 = vpack.c.bf16 %v486_v46, %v485_v45  ;;  %v505_v53 = vld [vmem:[#allocation10 + $0xd0] sm:$0xff]  ;;  %v506_v54 = vld [vmem:[#allocation10 + $0xd8] sm:$0xff] }
  0x91   :  { %811 = vmatprep.subr.bf16.mxu0 %v810_v50  ;;  %v838_v50 = vpack.c.bf16 %v504_v48, %v503_v47 }
  0x92   :  { %773 = vmatpush1.bf16.msra.mxu1 %v772_v59  ;;  %v816_v59 = vpack.c.bf16 %v382_v58, %v381_v57  ;;  %v489_v57 = vld [vmem:[#allocation10 + $0x50] sm:$0xff]  ;;  %v490_v58 = vld [vmem:[#allocation10 + $0x58] sm:$0xff] }
  0x93   :  { %775 = vmatprep.subr.bf16.mxu1 %v774_v60  ;;  %v137_v60 = vlaneseq }
  0x94   :  { %813 = vmatpush3.bf16.msra.mxu0 %v812_v55  ;;  %v840_v55 = vpack.c.bf16 %v488_v52, %v487_v51 }
  0x95   :  { %815 = vmatprep.subr.bf16.mxu0 %v814_v56  ;;  %v138_v61 = vshrl.u32 %v137_v60, 7  ;;  %v842_v56 = vpack.c.bf16 %v506_v54, %v505_v53  ;;  %v508_v60 = vld [vmem:[#allocation10 + $0xe8] sm:$0xff] }
  0x96   :  { %777 = vmatpush1.bf16.msra.mxu1 %v776_v1 }
  0x97   :  { %779 = vmatprep.subr.bf16.mxu1 %v778_v2  ;;  %v139_v62 = vsub.s32 0, %v138_v61  ;;  %v143_v0 = vsub.s32 1, %v138_v61  ;;  %v844_v61 = vpack.c.bf16 %v490_v58, %v489_v57 }
  0x98   :  { %817 = vmatpush3.bf16.msra.mxu0 %v816_v59  ;;  %v507_v59 = vld [vmem:[#allocation10 + $0xe0] sm:$0xff] }
  0x99   :  { %v140_v1 = vrot.slane %v135_v63, %v139_v62  ;;  %v144_v2 = vrot.slane %v135_v63, %v143_v0  ;;  %v289_v19 = vrot.slane %v284_v18, %v139_v62  ;;  %v293_v20 = vrot.slane %v284_v18, %v143_v0  ;;  %v491_v63 = vld [vmem:[#allocation10 + $0x60] sm:$0xff]  ;;  %v492_v0 = vld [vmem:[#allocation10 + $0x68] sm:$0xff] }
  0x9a   :  { %781 = vmatpush1.bf16.msra.mxu1 %v780_v7  ;;  %v846_v62 = vpack.c.bf16 %v508_v60, %v507_v59 }
  0x9b   :  { %783 = vmatprep.subr.bf16.mxu1 %v782_v8 }
  0x9e   :  { %785 = vmatpush1.bf16.msra.mxu1 %v784_v11  ;;  %v818_v11 = vpack.c.bf16 %v400_v10, %v399_v9  ;;  %v622_v9 = vld [vmem:[%s1221_s6] ss:$0 sm:$0xff] }
  0x9f   :  { %787 = vmatprep.subr.bf16.mxu1 %v786_v14  ;;  %v820_v14 = vpack.c.bf16 %v384_v13, %v383_v12 }
  0xa0   :  { %819 = vmatprep.subr.bf16.mxu0 %v818_v11 }
  0xa1   :  { %821 = vmatpush3.bf16.msra.mxu0 %v820_v14 }
  0xa2   :  { %789 = vmatpush1.bf16.msra.mxu1 %v788_v17  ;;  %v822_v17 = vpack.c.bf16 %v496_v16, %v495_v15 }
  0xa4   :  { %823 = vmatprep.subr.bf16.mxu0 %v822_v17 }
 0x151   :  { %v213_v3 = vpop.f32.mrb[0].mxu0 }
 0x152   :  { %v214_v4 = vadd.f32 %v213_v3, %v140_v1  ;;  %v215_v5 = vpop.f32.mrb[1].mxu0  ;;  %v509_v1 = vld [vmem:[#allocation10 + $0xf0] sm:$0xff]  ;;  %v848_v3 = vpack.c.bf16 %v492_v0, %v491_v63 }
 0x153   :  { %v216_v6 = vadd.f32 %v215_v5, %v144_v2  ;;  %v510_v2 = vld [vmem:[#allocation10 + $0xf8] sm:$0xff]  ;;  %v493_v5 = vld [vmem:[#allocation10 + $0x70] sm:$0xff] }
 0x154   :  { %v218_v8 = vmax.f32 %v214_v4, 0.0  ;;  %v850_v4 = vpack.c.bf16 %v510_v2, %v509_v1 }
 0x155   :  { %v219_v7 = vmax.f32 %v216_v6, 0.0  ;;  %v494_v6 = vld [vmem:[#allocation10 + $0x78] sm:$0xff] }
 0x157   :  { %360 = vmatprep.mubr.f32.mxu1 %v219_v7  ;;  %v852_v7 = vpack.c.bf16 %v494_v6, %v493_v5 }
 0x158   :  { %361 = vmatmul.mubr.f32.vlgmr.msra.gmra.mrb[0].mxu1 %v218_v8 }
 0x22b   :  { %v362_v21 = vpop.f32.mrb[0].mxu1 }
 0x22c   :  { %v1182_v22 = vadd.f32 %v362_v21, %v289_v19  ;;  %v364_v23 = vpop.f32.mrb[1].mxu1 }
 0x22d   :  { %v365_v26 = vadd.f32 %v364_v23, %v293_v20 }
 0x22e   :  { %v367_v31 = vmax.f32 %v1182_v22, 0.0 }
 0x22f   :  { %v368_v29 = vmax.f32 %v365_v26, 0.0 }
 0x231   :  { %472 = vmatprep.mubr.f32.mxu0 %v368_v29 }
 0x232   :  { %473 = vmatmul.mubr.f32.vlgmr.msra.gmra.mrb[2].mxu0 %v367_v31 }
 0x233   :  { %825 = vmatpush3.bf16.msra.mxu0 %v824_v30  ;;  %582 = vmatprep.mubr.f32.mxu0 %v368_v29 }
 0x234   :  { %827 = vmatprep.subr.bf16.mxu0 %v826_v32 }
 0x237   :  { %829 = vmatpush3.bf16.msra.mxu0 %v828_v37 }
 0x238   :  { %831 = vmatprep.subr.bf16.mxu0 %v830_v38 }
 0x23b   :  { %833 = vmatpush3.bf16.msra.mxu0 %v832_v43 }
 0x23c   :  { %835 = vmatprep.subr.bf16.mxu0 %v834_v44 }
 0x23f   :  { %837 = vmatpush3.bf16.msra.mxu0 %v836_v49 }
 0x240   :  { %839 = vmatprep.subr.bf16.mxu0 %v838_v50 }
 0x243   :  { %841 = vmatpush3.bf16.msra.mxu0 %v840_v55 }
 0x244   :  { %843 = vmatprep.subr.bf16.mxu0 %v842_v56 }
 0x247   :  { %845 = vmatpush3.bf16.msra.mxu0 %v844_v61 }
 0x248   :  { %847 = vmatprep.subr.bf16.mxu0 %v846_v62 }
 0x24b   :  { %849 = vmatpush3.bf16.msra.mxu0 %v848_v3 }
 0x24c   :  { %851 = vmatprep.subr.bf16.mxu0 %v850_v4 }
 0x24f   :  { %853 = vmatpush3.bf16.msra.mxu0 %v852_v7 }
 0x252   :  { %583 = vmatmul.mubr.f32.vlgmr.msra.gmra.mrb[4].mxu0 %v367_v31 }
 0x305   :  { %v656_v8 = vpop.f32.mrb[2].mxu0 }
 0x306   :  { %v657_v10 = vpop.f32.mrb[3].mxu0 }
 0x307   :  { %v658_v11 = vadd.f32 %v657_v10, %v656_v8 }
 0x309   :  { %v475_v12 = vadd.f32 %v658_v11, %v622_v9 }
 0x30b   :  { %478 = vst [vmem:[#allocation11] sm:$0xff] %v475_v12 }
 0x30c   :  { %987 = shalt.err (!%p984_p2)
}
 0x30d   :  { %s988_s26 = scalar_lea.hbm %s1224_s9, 128 }
 0x30e   :  { %p989_p3 = scmp.ne.s32.totalorder %s1224_s9, %s988_s26  ;;  %p992_p4 = scmp.lt.u32.totalorder %s988_s26, %s1224_s9 }
 0x310   :  { %p994_p5 = pnand %p992_p4, %p989_p3 }
 0x312   :  { %997 = shalt.err (!%p994_p5)
}
 0x313   :  { %600 = dma.vmem_to_hbm [thread:$0]  %s598_s18, 128, %s1224_s9, [#allocation4]   ;;  %v623_v14 = vld [vmem:[%s1223_s8] ss:$0 sm:$0xff] }
 0x314   :  { %s1041_s13 = smov [#allocation12]  }
 0x315   :  { %s607_s5 = sshll.u32 %s1041_s13, 4  ;;  %s608_s5 = int_to_ptr.vmem [resolvable:$true] %s607_s5 }
 0x316   :  { %s998_s28 = scalar_lea.vmem %s608_s5, 128  ;;  %p1003_p7 = scmp.lt.s32.totalorder %s608_s5, %s608_s5 }
 0x317   :  { %p999_p6 = scmp.ne.s32.totalorder %s608_s5, %s998_s28  ;;  %p1004_p8 = scmp.lt.s32.totalorder %s998_s28, %s998_s28 }
 0x319   :  { %p1005_p9 = por %p1004_p8, %p1003_p7 }
 0x31b   :  { %p1006_p10 = pnand %p1005_p9, %p999_p6 }
 0x325   :  { %v691_v13 = vpop.f32.mrb[4].mxu0 }
 0x326   :  { %v692_v15 = vpop.f32.mrb[5].mxu0 }
 0x327   :  { %v693_v16 = vadd.f32 %v692_v15, %v691_v13 }
 0x329   :  { %v585_v17 = vadd.f32 %v693_v16, %v623_v14 }
 0x32b   :  { %v588_v18 = vmax.f32 %v585_v17, -20.0 }
 0x32d   :  { %v589_v19 = vmin.f32 %v588_v18, 2.0 }
 0x32f   :  { %590 = vst [vmem:[#allocation12] sm:$0xff] %v589_v19 }
 0x330   :  { %1009 = shalt.err (!%p1006_p10)
}
 0x331   :  { %s1010_s8 = scalar_lea.hbm %s1225_s10, 128 }
 0x332   :  { %p1011_p11 = scmp.ne.s32.totalorder %s1225_s10, %s1010_s8  ;;  %p1014_p12 = scmp.lt.u32.totalorder %s1010_s8, %s1225_s10 }
 0x334   :  { %p1016_p13 = pnand %p1014_p12, %p1011_p11 }
 0x336   :  { %1019 = shalt.err (!%p1016_p13)
}
 0x337   :  { %610 = dma.vmem_to_hbm [thread:$0]  %s608_s5, 128, %s1225_s10, [#allocation13]  }
 0x338   :  { %1026 = dma.done.wait [#allocation4], 128  }
 0x339   :  { %1027 = vsyncadd [#allocation4], 4294967168 }
 0x33a   :  { %1028 = dma.done.wait [#allocation13], 128  }
 0x33b   :  { %1029 = vsyncadd [#allocation13], 4294967168 }
 0x33c   :  { %617 = vsyncpa [#allocation3], 1 }
 0x33d   :  { %618 = vsyncpa [#allocation6], 1 }
 0x33e   :  { %619 = vsyncpa [#allocation9], 1 }
 0x33f   :  { %620 = vsyncpa [#allocation4], 1 }
 0x340   :  { %621 = vsyncpa [#allocation13], 1 }

</bundles_post_ra>
